<compile_context>
chip_gen: v7x
topology: tpu7x:2x2x1
jax: 0.10.0
libtpu: 0.0.40
codegen_flags: <defaults>
</compile_context>

<pallas_src>
import jax
import jax.numpy as jnp
from jax.experimental import pallas as pl
from jax.experimental.pallas import tpu as pltpu


_LANE = 128                     # lane width for the flattened fast path
_SMALL_INPUT_BYTES = 256 << 10  # below this, plain XLA elementwise is faster


def _round_up(x: int, m: int) -> int:
    return ((x + m - 1) // m) * m


def _gen_params():
    """Generation-aware tiling knobs: (target_tile_bytes, min_grid_steps, num_tc)."""
    kind = ""
    try:
        kind = jax.devices()[0].device_kind.lower()
    except Exception:
        pass
    if "7" in kind:
        # v7x: 64 MiB VMEM / TC, 2 TCs -> conservative tiles, even grid length.
        return 4 << 20, 8, 2
    if "v5" in kind or "v6" in kind:
        # v5e/v6e: 1 TC, 128 MiB VMEM -> fewer, larger tiles amortize the
        # ~0.35 us/step pipeline overhead; explicit vmem limit (v5e scoped
        # default is only 16 MiB).
        return 8 << 20, 2, 1
    # Unknown part: safe middle ground.
    return 4 << 20, 4, 2


def _sigmoid_kernel(x_ref, o_ref):
    x = x_ref[...]
    # sigmoid(x) = 0.5 * tanh(x / 2) + 0.5  -> single EUP push, VPU does the rest.
    o_ref[...] = 0.5 * jnp.tanh(0.5 * x) + 0.5


def sigmoid_pallas(x: jax.Array, *, force_pallas: bool = False) -> jax.Array:
    """Elementwise sigmoid over an arbitrary-shaped float array."""
    total = x.size
    if total == 0:
        return x
    itemsize = jnp.dtype(x.dtype).itemsize

    # Small-input fast path: pallas_call setup cost dominates tiny tensors.
    if not force_pallas and total * itemsize < _SMALL_INPUT_BYTES:
        return jax.nn.sigmoid(x)

    orig_shape = x.shape
    target_tile_bytes, min_steps, num_tc = _gen_params()
    sub = max(8, 32 // itemsize)   # sublane multiple: 8 f32, 16 bf16, 32 int8/fp8

    # Pick a zero-copy 2-D presentation (R, C) of the data whenever possible.
    # The ragged final row-block is masked by Pallas, so no pad / slice needed.
    pad_tail = 0
    if total % _LANE == 0:
        # Fully lane-dense slab: unmasked full-width vector stores.
        R, C = total // _LANE, _LANE
    elif (x.ndim >= 2 and x.shape[-1] >= _LANE and
          _round_up(x.shape[-1], _LANE) * itemsize * sub <= target_tile_bytes):
        # Keep the original trailing dim as lanes: the HBM DMA stays fully
        # contiguous; only the last partial lane-register's store is masked.
        C = x.shape[-1]
        R = total // C
    else:
        # Rare truly-ragged flat tail: pad up to the next lane multiple.
        # TODO(synk): a manual pl.ANY DMA epilogue could avoid this extra copy.
        R, C = pl.cdiv(total, _LANE), _LANE
        pad_tail = R * _LANE - total

    if pad_tail:
        x2d = jnp.pad(x.reshape(-1), (0, pad_tail)).reshape(R, C)
    else:
        x2d = x.reshape(R, C)   # contiguous reshape: free (bitcast), no HBM pass

    lane_pad_bytes = _round_up(C, _LANE) * itemsize         # VMEM bytes per tile row
    target_rows = max(sub, (target_tile_bytes // lane_pad_bytes) // sub * sub)

    steps = pl.cdiv(R, target_rows)
    steps = max(steps, min(min_steps, pl.cdiv(R, sub)))
    if num_tc == 2 and steps > 1 and steps % 2 == 1:
        steps += 1                                           # equal tiles per TC
    block_rows = max(sub, _round_up(pl.cdiv(R, steps), sub))
    block_rows = min(block_rows, target_rows)
    grid = (pl.cdiv(R, block_rows),)

    tile_bytes = block_rows * lane_pad_bytes
    # Double-buffered input + output tiles, plus headroom.
    # <= 24 MiB on v7x-style parts, <= 40 MiB on v5e/v6e.
    vmem_limit = 2 * 2 * tile_bytes + (8 << 20)

    out2d = pl.pallas_call(
        _sigmoid_kernel,
        out_shape=jax.ShapeDtypeStruct((R, C), x.dtype),
        grid_spec=pltpu.PrefetchScalarGridSpec(
            num_scalar_prefetch=0,
            grid=grid,
            in_specs=[pl.BlockSpec((block_rows, C), lambda i: (i, 0))],
            out_specs=pl.BlockSpec((block_rows, C), lambda i: (i, 0)),
        ),
        compiler_params=pltpu.CompilerParams(
            dimension_semantics=("parallel",),
            vmem_limit_bytes=vmem_limit,
        ),
    )(x2d)

    if pad_tail:
        return out2d.reshape(-1)[:total].reshape(orig_shape)
    return out2d.reshape(orig_shape)


class SigmoidPallas:
    """Mirrors the PyTorch Sigmoid module (forward + backward); the forward
    hot path runs through the Pallas kernel."""

    def __init__(self):
        self.sigmoid = None

    def forward(self, inp):
        self.sigmoid = sigmoid_pallas(inp)
        return self.sigmoid

    def backward(self, gradwrtoutput):
        # Elementwise backward on the cached activation; plain JAX glue.
        # TODO(synk): caching on the Python object is not jit/vmap-safe; a
        # custom_vjp returning residuals would be the training-path version.
        return self.sigmoid * (1.0 - self.sigmoid) * gradwrtoutput

    def get_param(self):
        return [(None, None)]


if __name__ == "__main__":
    key = jax.random.PRNGKey(0)
    k1, k2, k3, k4 = jax.random.split(key, 4)

    # Small shape consistent with "FloatTensor of size m": 8 samples x 32 units.
    x = jax.random.normal(k1, (8, 32), dtype=jnp.float32)

    # 1) Module forward/backward (small input -> fast path, still exact).
    mod = SigmoidPallas()
    y = jax.block_until_ready(mod.forward(x))
    ref = jax.nn.sigmoid(x)
    assert jnp.allclose(y, ref, atol=1e-6), "module forward mismatch"

    g = jax.random.normal(k2, x.shape, dtype=jnp.float32)
    dx = jax.block_until_ready(mod.backward(g))
    ref_dx = ref * (1.0 - ref) * g
    assert jnp.allclose(dx, ref_dx, atol=1e-6), "module backward mismatch"

    # 2) Force the tiny input through the kernel: lane-dense zero-copy path,
    #    single (ragged) row-block.
    y_k = jax.block_until_ready(sigmoid_pallas(x, force_pallas=True))
    assert jnp.allclose(y_k, ref, atol=1e-6), "pallas mismatch (small, lane-dense)"

    # 3) Size multiple of 128: zero-copy lane-dense path, multi-step grid.
    x_a = jax.random.normal(k3, (512, 256), dtype=jnp.float32)
    y_a = jax.block_until_ready(sigmoid_pallas(x_a, force_pallas=True))
    assert jnp.allclose(y_a, jax.nn.sigmoid(x_a), atol=1e-6), \
        "pallas mismatch (lane-dense multi-step)"

    # 4) Awkward trailing dim (333): zero-copy keep-last-dim path with a
    #    ragged final row-block (no pad, no output slice).
    x_b = jax.random.normal(k4, (1000, 333), dtype=jnp.float32)
    y_b = jax.block_until_ready(sigmoid_pallas(x_b))
    assert jnp.allclose(y_b, jax.nn.sigmoid(x_b), atol=1e-6), \
        "pallas mismatch (ragged lane dim)"

    # 5) bf16 exercises the per-dtype sublane rounding (block rows % 16 == 0).
    x_c = x_a.astype(jnp.bfloat16)
    y_c = jax.block_until_ready(sigmoid_pallas(x_c, force_pallas=True))
    assert jnp.allclose(y_c.astype(jnp.float32),
                        jax.nn.sigmoid(x_c).astype(jnp.float32), atol=2e-2), \
        "pallas mismatch (bf16)"

    print("KERNEL_OK")
</pallas_src>

<mosaic_0001>
module attributes {stable_mosaic.version = 11 : i64} {
  func.func @_sigmoid_kernel(%arg0: i32, %arg1: memref<8x128xf32, #tpu.memory_space<vmem>>, %arg2: memref<8x128xf32, #tpu.memory_space<vmem>>) attributes {dimension_semantics = [#tpu.dimension_semantics<parallel>], iteration_bounds = array<i64: 1>, scalar_prefetch = 0 : i64, scratch_operands = 0 : i64, tpu.core_type = #tpu.core_type<tc>, window_params = [{transform_indices = @transform_0, window_bounds = array<i64: 8, 128>}, {transform_indices = @transform_1, window_bounds = array<i64: 8, 128>}]} {
    %c0 = arith.constant 0 : index
    %c0_0 = arith.constant 0 : index
    %0 = vector.load %arg1[%c0, %c0_0] : memref<8x128xf32, #tpu.memory_space<vmem>>, vector<8x128xf32>
    %cst = arith.constant 5.000000e-01 : f32
    %1 = vector.broadcast %cst : f32 to vector<8x128xf32>
    %2 = arith.mulf %1, %0 : vector<8x128xf32>
    %3 = math.tanh %2 : vector<8x128xf32>
    %cst_1 = arith.constant 5.000000e-01 : f32
    %4 = vector.broadcast %cst_1 : f32 to vector<8x128xf32>
    %5 = arith.mulf %4, %3 : vector<8x128xf32>
    %cst_2 = arith.constant 5.000000e-01 : f32
    %6 = vector.broadcast %cst_2 : f32 to vector<8x128xf32>
    %7 = arith.addf %5, %6 : vector<8x128xf32>
    %c0_3 = arith.constant 0 : index
    %c0_4 = arith.constant 0 : index
    %8 = vector.load %arg2[%c0_3, %c0_4] : memref<8x128xf32, #tpu.memory_space<vmem>>, vector<8x128xf32>
    tpu.vector_store %arg2[%c0_3, %c0_4], %7 {strides = array<i32>} : memref<8x128xf32, #tpu.memory_space<vmem>>, vector<8x128xf32>,
    return
  }
  func.func @transform_0(%arg0: i32) -> (i32, i32) {
    %c0_i32 = arith.constant 0 : i32
    %c0_i32_0 = arith.constant 0 : i32
    return %arg0, %c0_i32 : i32, i32
  }
  func.func @transform_1(%arg0: i32) -> (i32, i32) {
    %c0_i32 = arith.constant 0 : i32
    %c0_i32_0 = arith.constant 0 : i32
    return %arg0, %c0_i32 : i32, i32
  }
}

</mosaic_0001>

<bundles_post_ra>
// kernel: tpu_custom_call.1
= control target key start
LH: loop header
LB: loop body
LE: loop exit
PB: predicated region body
PF: predicated region fallthrough
CT: control target
= control target key end

     0   :  { %6 = vsyncpa [#allocation3], 0  ;;  %s144_s0 = inlined_call_operand.hbm [shape: f32[2,128], index: 0, kind: input, shape index: {}]   ;;  %s145_s1 = inlined_call_operand.hbm [shape: f32[2,128], index: 1, kind: output, shape index: {}]  }
   0x1   :  { %7 = vsyncpa [#allocation4], 0 }
   0x2   :  { %12 = vsyncadd [#allocation3], 96  ;;  %s100_s6 = smov [#allocation2]   ;;  %s52_s10 = scalar_lea.hbm %s144_s0, 32 }
   0x3   :  { %s13_s7 = sshll.u32 %s100_s6, 4  ;;  %p53_p0 = scmp.ne.s32.totalorder %s144_s0, %s52_s10  ;;  %s14_s7 = int_to_ptr.vmem [resolvable:$true] %s13_s7 }
   0x4   :  { %p56_p1 = scmp.lt.u32.totalorder %s52_s10, %s144_s0 }
   0x6   :  { %p58_p2 = pnand %p56_p1, %p53_p0 }
   0x8   :  { %61 = shalt.err (!%p58_p2)
}
   0x9   :  { %s62_s15 = scalar_lea.vmem %s14_s7, 32  ;;  %s66_s16 = scalar_lea.vmem %s14_s7, 128 }
   0xa   :  { %p63_p3 = scmp.ne.s32.totalorder %s14_s7, %s62_s15  ;;  %p67_p4 = scmp.lt.s32.totalorder %s14_s7, %s14_s7 }
   0xb   :  { %p68_p5 = scmp.lt.s32.totalorder %s66_s16, %s62_s15 }
   0xd   :  { %p69_p6 = por %p68_p5, %p67_p4 }
   0xf   :  { %p70_p7 = pnand %p69_p6, %p63_p3 }
  0x11   :  { %73 = shalt.err (!%p70_p7)
}
  0x12   :  { %s101_s17 = smov 32   ;;  %s102_s18 = smov 2  }
  0x13   :  { %19 = dma.hbm_to_vmem [thread:$0]  %s144_s0, 32, %s14_s7, [#allocation3], %s101_s17, %s101_s17, %s102_s18  }
  0x14   :  { %96 = dma.done.wait [#allocation3], 128  }
  0x15   :  { %97 = vsyncadd [#allocation3], 4294967168  ;;  %v23_v0 = vld [vmem:[#allocation2] sm:$0xff] }
  0x16   :  { %v24_v1 = vmul.f32 0.5, %v23_v0 }
  0x18   :  { %50 = vtanh.f32 %v24_v1 }
  0x22   :  { %v51_v2 = vpop.eup %50 }
  0x23   :  { %v26_v3 = vmul.f32 0.5, %v51_v2 }
  0x25   :  { %v27_v4 = vadd.f32 0.5, %v26_v3 }
  0x27   :  { %28 = vst [vmem:[#allocation5] sm:$0xff] %v27_v4 }
  0x28   :  { %33 = vsyncadd [#allocation4], 96  ;;  %s103_s21 = smov [#allocation5]  }
  0x29   :  { %s34_s22 = sshll.u32 %s103_s21, 4  ;;  %s35_s22 = int_to_ptr.vmem [resolvable:$true] %s34_s22 }
  0x2a   :  { %s74_s23 = scalar_lea.vmem %s35_s22, 32  ;;  %s78_s24 = scalar_lea.vmem %s35_s22, 128 }
  0x2b   :  { %p75_p8 = scmp.ne.s32.totalorder %s35_s22, %s74_s23  ;;  %p79_p9 = scmp.lt.s32.totalorder %s35_s22, %s35_s22 }
  0x2c   :  { %p80_p10 = scmp.lt.s32.totalorder %s78_s24, %s74_s23 }
  0x2e   :  { %p81_p11 = por %p80_p10, %p79_p9 }
  0x30   :  { %p82_p12 = pnand %p81_p11, %p75_p8 }
  0x32   :  { %85 = shalt.err (!%p82_p12)
}
  0x33   :  { %s86_s26 = scalar_lea.hbm %s145_s1, 32 }
  0x34   :  { %p87_p13 = scmp.ne.s32.totalorder %s145_s1, %s86_s26  ;;  %p90_p0 = scmp.lt.u32.totalorder %s86_s26, %s145_s1 }
  0x36   :  { %p92_p1 = pnand %p90_p0, %p87_p13 }
  0x38   :  { %95 = shalt.err (!%p92_p1)
}
  0x39   :  { %40 = dma.vmem_to_hbm [thread:$0]  %s35_s22, 32, %s145_s1, [#allocation4], %s101_s17, %s101_s17, %s102_s18  }
  0x3a   :  { %98 = dma.done.wait [#allocation4], 128  }
  0x3b   :  { %99 = vsyncadd [#allocation4], 4294967168 }
  0x3c   :  { %44 = vsyncpa [#allocation3], 1 }
  0x3d   :  { %45 = vsyncpa [#allocation4], 1 }

</bundles_post_ra>
